<compile_context>
chip_gen: v6e
topology: v6e:2x2x1
jax: 0.10.0
libtpu: 0.0.40
codegen_flags: <defaults>
</compile_context>

<pallas_src>
import functools

import jax
import jax.numpy as jnp
from jax.experimental import pallas as pl
from jax.experimental.pallas import tpu as pltpu


_TARGET_BLOCK_BYTES = 2 * 1024 * 1024   # ~2 MiB blocks: fits v7x, near roofline everywhere
_VMEM_LIMIT_BYTES = 32 * 1024 * 1024    # explicit scoped-VMEM budget (safe on v5e/v6e/v7x)


def _stats_kernel(x_ref, stats_ref, sum_acc, sq_acc, *, hw, hw_tile):
    """Accumulate per-(n, c) sum(x) and sum(x*x) over streamed spatial tiles.

    x_ref     : (Nb, C, hw_tile) input block
    stats_ref : (Nb, C, 2) output block resident across the HW grid axis;
                [..., 0] = sum, [..., 1] = sum of squares
    sum_acc / sq_acc : (Nb, C, hw_tile) f32 VMEM scratch — lane-wide partials,
                VALU-only adds in the loop; one XLU reduce on the last tile.
    """
    t = pl.program_id(1)

    @pl.when(t == 0)
    def _():
        sum_acc[...] = jnp.zeros_like(sum_acc)
        sq_acc[...] = jnp.zeros_like(sq_acc)

    x = x_ref[...].astype(jnp.float32)
    if hw % hw_tile != 0:
        # Tail tile extends past HW: padded lanes hold garbage -> mask to 0
        # so they don't pollute the reduction.
        lane = jax.lax.broadcasted_iota(jnp.int32, x.shape, 2)
        x = jnp.where(t * hw_tile + lane < hw, x, 0.0)
    sum_acc[...] += x
    sq_acc[...] += x * x

    @pl.when(t == pl.num_programs(1) - 1)
    def _():
        stats_ref[:, :, 0:1] = jnp.sum(sum_acc[...], axis=2, keepdims=True)
        stats_ref[:, :, 1:2] = jnp.sum(sq_acc[...], axis=2, keepdims=True)


def _norm_kernel(x_ref, scale_ref, shift_ref, o_ref):
    # Fused normalize + class-conditional affine: out = x * scale + shift.
    x = x_ref[...].astype(jnp.float32)
    o_ref[...] = (x * scale_ref[...] + shift_ref[...]).astype(o_ref.dtype)


def _pick_tiles(n, c, hw, itemsize, target_bytes=_TARGET_BLOCK_BYTES):
    """Choose (n_block, hw_tile, n_hw_tiles).

    hw_tile is a multiple of 128 whenever hw >= 128 (never falls back to an
    unbounded full extent), capped so one (n_block, C, hw_tile) block stays
    around target_bytes; non-dividing tails are masked in the stats kernel.
    n_block is the largest divisor of N keeping the block under budget.
    """
    if hw < 128:
        hw_tile = hw  # full extent (legal; lane-sparse but correct)
    else:
        lane_budget = (target_bytes // max(1, c * itemsize)) // 128 * 128
        lane_budget = max(128, lane_budget)
        hw_tile = min((hw // 128) * 128, lane_budget)
    n_hw_tiles = -(-hw // hw_tile)

    block_bytes = c * hw_tile * itemsize
    n_block = 1
    for d in range(1, n + 1):
        if n % d == 0 and d * block_bytes <= target_bytes:
            n_block = d
    return n_block, hw_tile, n_hw_tiles


@functools.partial(jax.jit, static_argnames=("eps",))
def categorical_conditional_batchnorm(x_nchw, y_cats, weight, bias, *, eps=2e-5):
    """Forward of CategoricalConditionalBatchNorm (training mode).

    x_nchw : (N, C, H, W) float
    y_cats : (N,)         int32 category ids
    weight : (num_cats, C) float
    bias   : (num_cats, C) float
    returns (N, C, H, W)
    """
    N, C, H, W = x_nchw.shape
    HW = H * W
    x = x_nchw.reshape(N, C, HW)  # free reshape; spatial axis on lanes

    nb, hw_tile, n_hw_tiles = _pick_tiles(N, C, HW, x.dtype.itemsize)
    n_blocks = N // nb

    # ---- pass 1: streamed per-(n, c) sum / sum-of-squares ----
    stats = pl.pallas_call(
        functools.partial(_stats_kernel, hw=HW, hw_tile=hw_tile),
        out_shape=jax.ShapeDtypeStruct((N, C, 2), jnp.float32),
        grid=(n_blocks, n_hw_tiles),
        in_specs=[pl.BlockSpec((nb, C, hw_tile), lambda n, t: (n, 0, t))],
        out_specs=pl.BlockSpec((nb, C, 2), lambda n, t: (n, 0, 0)),
        scratch_shapes=[
            pltpu.VMEM((nb, C, hw_tile), jnp.float32),
            pltpu.VMEM((nb, C, hw_tile), jnp.float32),
        ],
        compiler_params=pltpu.CompilerParams(
            dimension_semantics=("parallel", "arbitrary"),
            vmem_limit_bytes=_VMEM_LIMIT_BYTES,
        ),
    )(x)

    # ---- tiny O(N*C) glue: batch stats -> fused per-(n, c) scale / shift ----
    cnt = jnp.float32(N * HW)
    s = jnp.sum(stats[:, :, 0], axis=0)            # (C,)
    ss = jnp.sum(stats[:, :, 1], axis=0)           # (C,)
    mean = s / cnt
    # Biased variance (training-mode F.batch_norm); clamp tiny negatives from
    # E[x^2] - mean^2 cancellation (f32 accumulation throughout).
    var = jnp.maximum(ss / cnt - mean * mean, 0.0)
    inv = jax.lax.rsqrt(var + eps)                  # (C,)

    cats = y_cats.reshape(-1)
    gamma = jnp.take(weight, cats, axis=0).astype(jnp.float32)  # (N, C)
    beta = jnp.take(bias, cats, axis=0).astype(jnp.float32)     # (N, C)
    scale = gamma * inv[None, :]                                # (N, C)
    shift = beta - mean[None, :] * scale                        # (N, C)
    scale = scale[:, :, None]                                   # (N, C, 1)
    shift = shift[:, :, None]

    # ---- pass 2: streamed normalize + conditional affine ----
    out = pl.pallas_call(
        _norm_kernel,
        out_shape=jax.ShapeDtypeStruct((N, C, HW), x.dtype),
        grid=(n_blocks, n_hw_tiles),
        in_specs=[
            pl.BlockSpec((nb, C, hw_tile), lambda n, t: (n, 0, t)),
            pl.BlockSpec((nb, C, 1), lambda n, t: (n, 0, 0)),
            pl.BlockSpec((nb, C, 1), lambda n, t: (n, 0, 0)),
        ],
        out_specs=pl.BlockSpec((nb, C, hw_tile), lambda n, t: (n, 0, t)),
        compiler_params=pltpu.CompilerParams(
            dimension_semantics=("parallel", "parallel"),
            vmem_limit_bytes=_VMEM_LIMIT_BYTES,
        ),
    )(x, scale, shift)

    return out.reshape(N, C, H, W)


def _reference(x_nchw, y_cats, weight, bias, eps=2e-5):
    # Pure-JAX reference mirroring the PyTorch forward (training mode).
    mean = jnp.mean(x_nchw, axis=(0, 2, 3), keepdims=True)
    var = jnp.mean((x_nchw - mean) ** 2, axis=(0, 2, 3), keepdims=True)
    out = (x_nchw - mean) / jnp.sqrt(var + eps)
    w = weight[y_cats][:, :, None, None]
    b = bias[y_cats][:, :, None, None]
    return out * w + b


def _run_case(key, N, C, H, W, num_cats):
    kx, kw, kb, kc = jax.random.split(key, 4)
    x = jax.random.normal(kx, (N, C, H, W), dtype=jnp.float32)
    y_cats = jax.random.randint(kc, (N,), 0, num_cats, dtype=jnp.int32)
    # Deterministic non-trivial affine params (reset_parameters() uses 1/0
    # which would make the gather path invisible).
    weight = 1.0 + 0.1 * jax.random.normal(kw, (num_cats, C), dtype=jnp.float32)
    bias = 0.1 * jax.random.normal(kb, (num_cats, C), dtype=jnp.float32)

    out = categorical_conditional_batchnorm(x, y_cats, weight, bias, eps=2e-5)
    out = jax.block_until_ready(out)
    ref = _reference(x, y_cats, weight, bias, eps=2e-5)
    assert out.shape == (N, C, H, W)
    err = jnp.max(jnp.abs(out - ref))
    assert jnp.allclose(out, ref, atol=1e-4, rtol=1e-4), f"max abs err {err}"


if __name__ == "__main__":
    key = jax.random.PRNGKey(0)
    k1, k2 = jax.random.split(key, 2)

    # Primary small shape (lane-aligned HW, N-blocking active).
    _run_case(k1, N=2, C=4, H=16, W=16, num_cats=10)
    # Irregular shape: exercises the cdiv grid + masked-tail stats path.
    _run_case(k2, N=3, C=5, H=10, W=20, num_cats=7)

    print("KERNEL_OK")
</pallas_src>

<mosaic_0001>
module attributes {stable_mosaic.version = 11 : i64} {
  func.func @_stats_kernel(%arg0: i32, %arg1: i32, %arg2: memref<2x4x256xf32, #tpu.memory_space<vmem>>, %arg3: memref<2x4x2xf32, #tpu.memory_space<vmem>>, %arg4: memref<2x4x256xf32, #tpu.memory_space<vmem>>, %arg5: memref<2x4x256xf32, #tpu.memory_space<vmem>>) attributes {dimension_semantics = [#tpu.dimension_semantics<parallel>, #tpu.dimension_semantics<arbitrary>], iteration_bounds = array<i64: 1, 1>, scalar_prefetch = 0 : i64, scratch_operands = 2 : i64, tpu.core_type = #tpu.core_type<tc>, window_params = [{transform_indices = @transform_0, window_bounds = array<i64: 2, 4, 256>}, {transform_indices = @transform_1, window_bounds = array<i64: 2, 4, 2>}]} {
    %c0_i32 = arith.constant 0 : i32
    %0 = arith.cmpi eq, %arg1, %c0_i32 : i32
    %1 = arith.extui %0 : i1 to i32
    %c0_i32_0 = arith.constant 0 : i32
    %2 = arith.cmpi ne, %1, %c0_i32_0 : i32
    scf.if %2 {
      %cst = arith.constant 0.000000e+00 : f32
      %14 = vector.broadcast %cst : f32 to vector<2x4x256xf32>
      %c0_17 = arith.constant 0 : index
      %c0_18 = arith.constant 0 : index
      %c0_19 = arith.constant 0 : index
      %15 = vector.load %arg4[%c0_17, %c0_18, %c0_19] : memref<2x4x256xf32, #tpu.memory_space<vmem>>, vector<2x4x256xf32>
      tpu.vector_store %arg4[%c0_17, %c0_18, %c0_19], %14 {strides = array<i32>} : memref<2x4x256xf32, #tpu.memory_space<vmem>>, vector<2x4x256xf32>,
      %cst_20 = arith.constant 0.000000e+00 : f32
      %16 = vector.broadcast %cst_20 : f32 to vector<2x4x256xf32>
      %c0_21 = arith.constant 0 : index
      %c0_22 = arith.constant 0 : index
      %c0_23 = arith.constant 0 : index
      %17 = vector.load %arg5[%c0_21, %c0_22, %c0_23] : memref<2x4x256xf32, #tpu.memory_space<vmem>>, vector<2x4x256xf32>
      tpu.vector_store %arg5[%c0_21, %c0_22, %c0_23], %16 {strides = array<i32>} : memref<2x4x256xf32, #tpu.memory_space<vmem>>, vector<2x4x256xf32>,
    } else {
    }
    %c0 = arith.constant 0 : index
    %c0_1 = arith.constant 0 : index
    %c0_2 = arith.constant 0 : index
    %3 = vector.load %arg2[%c0, %c0_1, %c0_2] : memref<2x4x256xf32, #tpu.memory_space<vmem>>, vector<2x4x256xf32>
    %c0_3 = arith.constant 0 : index
    %c0_4 = arith.constant 0 : index
    %c0_5 = arith.constant 0 : index
    %4 = vector.load %arg4[%c0_3, %c0_4, %c0_5] : memref<2x4x256xf32, #tpu.memory_space<vmem>>, vector<2x4x256xf32>
    %5 = arith.addf %4, %3 : vector<2x4x256xf32>
    %c0_6 = arith.constant 0 : index
    %c0_7 = arith.constant 0 : index
    %c0_8 = arith.constant 0 : index
    %6 = vector.load %arg4[%c0_6, %c0_7, %c0_8] : memref<2x4x256xf32, #tpu.memory_space<vmem>>, vector<2x4x256xf32>
    tpu.vector_store %arg4[%c0_6, %c0_7, %c0_8], %5 {strides = array<i32>} : memref<2x4x256xf32, #tpu.memory_space<vmem>>, vector<2x4x256xf32>,
    %c0_9 = arith.constant 0 : index
    %c0_10 = arith.constant 0 : index
    %c0_11 = arith.constant 0 : index
    %7 = vector.load %arg5[%c0_9, %c0_10, %c0_11] : memref<2x4x256xf32, #tpu.memory_space<vmem>>, vector<2x4x256xf32>
    %8 = arith.mulf %3, %3 : vector<2x4x256xf32>
    %9 = arith.addf %7, %8 : vector<2x4x256xf32>
    %c0_12 = arith.constant 0 : index
    %c0_13 = arith.constant 0 : index
    %c0_14 = arith.constant 0 : index
    %10 = vector.load %arg5[%c0_12, %c0_13, %c0_14] : memref<2x4x256xf32, #tpu.memory_space<vmem>>, vector<2x4x256xf32>
    tpu.vector_store %arg5[%c0_12, %c0_13, %c0_14], %9 {strides = array<i32>} : memref<2x4x256xf32, #tpu.memory_space<vmem>>, vector<2x4x256xf32>,
    %c0_i32_15 = arith.constant 0 : i32
    %11 = arith.cmpi eq, %arg1, %c0_i32_15 : i32
    %12 = arith.extui %11 : i1 to i32
    %c0_i32_16 = arith.constant 0 : i32
    %13 = arith.cmpi ne, %12, %c0_i32_16 : i32
    scf.if %13 {
      %c0_17 = arith.constant 0 : index
      %c0_18 = arith.constant 0 : index
      %c0_19 = arith.constant 0 : index
      %14 = vector.load %arg4[%c0_17, %c0_18, %c0_19] : memref<2x4x256xf32, #tpu.memory_space<vmem>>, vector<2x4x256xf32>
      %cst = arith.constant dense<0.000000e+00> : vector<2x4xf32>
      %15 = vector.multi_reduction <add>, %14, %cst [2] : vector<2x4x256xf32> to vector<2x4xf32>
      %16 = vector.shape_cast %15 : vector<2x4xf32> to vector<2x4x1xf32>
      %c0_20 = arith.constant 0 : index
      %c0_21 = arith.constant 0 : index
      %c0_22 = arith.constant 0 : index
      %17 = vector.load %arg3[%c0_20, %c0_21, %c0_22] : memref<2x4x2xf32, #tpu.memory_space<vmem>>, vector<2x4x1xf32>
      tpu.vector_store %arg3[%c0_20, %c0_21, %c0_22], %16 {strides = array<i32>} : memref<2x4x2xf32, #tpu.memory_space<vmem>>, vector<2x4x1xf32>,
      %c0_23 = arith.constant 0 : index
      %c0_24 = arith.constant 0 : index
      %c0_25 = arith.constant 0 : index
      %18 = vector.load %arg5[%c0_23, %c0_24, %c0_25] : memref<2x4x256xf32, #tpu.memory_space<vmem>>, vector<2x4x256xf32>
      %cst_26 = arith.constant dense<0.000000e+00> : vector<2x4xf32>
      %19 = vector.multi_reduction <add>, %18, %cst_26 [2] : vector<2x4x256xf32> to vector<2x4xf32>
      %20 = vector.shape_cast %19 : vector<2x4xf32> to vector<2x4x1xf32>
      %c0_27 = arith.constant 0 : index
      %c0_28 = arith.constant 0 : index
      %c1 = arith.constant 1 : index
      %21 = vector.load %arg3[%c0_27, %c0_28, %c1] : memref<2x4x2xf32, #tpu.memory_space<vmem>>, vector<2x4x1xf32>
      tpu.vector_store %arg3[%c0_27, %c0_28, %c1], %20 {strides = array<i32>} : memref<2x4x2xf32, #tpu.memory_space<vmem>>, vector<2x4x1xf32>,
    } else {
    }
    return
  }
  func.func @transform_0(%arg0: i32, %arg1: i32) -> (i32, i32, i32) {
    %c0_i32 = arith.constant 0 : i32
    %c0_i32_0 = arith.constant 0 : i32
    return %arg0, %c0_i32, %arg1 : i32, i32, i32
  }
  func.func @transform_1(%arg0: i32, %arg1: i32) -> (i32, i32, i32) {
    %c0_i32 = arith.constant 0 : i32
    %c0_i32_0 = arith.constant 0 : i32
    %c0_i32_1 = arith.constant 0 : i32
    return %arg0, %c0_i32, %c0_i32_0 : i32, i32, i32
  }
}

module attributes {stable_mosaic.version = 11 : i64} {
  func.func @_norm_kernel(%arg0: i32, %arg1: i32, %arg2: memref<2x4x256xf32, #tpu.memory_space<vmem>>, %arg3: memref<2x4x1xf32, #tpu.memory_space<vmem>>, %arg4: memref<2x4x1xf32, #tpu.memory_space<vmem>>, %arg5: memref<2x4x256xf32, #tpu.memory_space<vmem>>) attributes {dimension_semantics = [#tpu.dimension_semantics<parallel>, #tpu.dimension_semantics<parallel>], iteration_bounds = array<i64: 1, 1>, scalar_prefetch = 0 : i64, scratch_operands = 0 : i64, tpu.core_type = #tpu.core_type<tc>, window_params = [{transform_indices = @transform_0, window_bounds = array<i64: 2, 4, 256>}, {transform_indices = @transform_1, window_bounds = array<i64: 2, 4, 1>}, {transform_indices = @transform_2, window_bounds = array<i64: 2, 4, 1>}, {transform_indices = @transform_3, window_bounds = array<i64: 2, 4, 256>}]} {
    %c0 = arith.constant 0 : index
    %c0_0 = arith.constant 0 : index
    %c0_1 = arith.constant 0 : index
    %0 = vector.load %arg2[%c0, %c0_0, %c0_1] : memref<2x4x256xf32, #tpu.memory_space<vmem>>, vector<2x4x256xf32>
    %c0_2 = arith.constant 0 : index
    %c0_3 = arith.constant 0 : index
    %c0_4 = arith.constant 0 : index
    %1 = vector.load %arg3[%c0_2, %c0_3, %c0_4] : memref<2x4x1xf32, #tpu.memory_space<vmem>>, vector<2x4x1xf32>
    %2 = vector.broadcast %1 : vector<2x4x1xf32> to vector<2x4x256xf32>
    %3 = arith.mulf %0, %2 : vector<2x4x256xf32>
    %c0_5 = arith.constant 0 : index
    %c0_6 = arith.constant 0 : index
    %c0_7 = arith.constant 0 : index
    %4 = vector.load %arg4[%c0_5, %c0_6, %c0_7] : memref<2x4x1xf32, #tpu.memory_space<vmem>>, vector<2x4x1xf32>
    %5 = vector.broadcast %4 : vector<2x4x1xf32> to vector<2x4x256xf32>
    %6 = arith.addf %3, %5 : vector<2x4x256xf32>
    %c0_8 = arith.constant 0 : index
    %c0_9 = arith.constant 0 : index
    %c0_10 = arith.constant 0 : index
    %7 = vector.load %arg5[%c0_8, %c0_9, %c0_10] : memref<2x4x256xf32, #tpu.memory_space<vmem>>, vector<2x4x256xf32>
    tpu.vector_store %arg5[%c0_8, %c0_9, %c0_10], %6 {strides = array<i32>} : memref<2x4x256xf32, #tpu.memory_space<vmem>>, vector<2x4x256xf32>,
    return
  }
  func.func @transform_0(%arg0: i32, %arg1: i32) -> (i32, i32, i32) {
    %c0_i32 = arith.constant 0 : i32
    %c0_i32_0 = arith.constant 0 : i32
    return %arg0, %c0_i32, %arg1 : i32, i32, i32
  }
  func.func @transform_1(%arg0: i32, %arg1: i32) -> (i32, i32, i32) {
    %c0_i32 = arith.constant 0 : i32
    %c0_i32_0 = arith.constant 0 : i32
    %c0_i32_1 = arith.constant 0 : i32
    return %arg0, %c0_i32, %c0_i32_0 : i32, i32, i32
  }
  func.func @transform_2(%arg0: i32, %arg1: i32) -> (i32, i32, i32) {
    %c0_i32 = arith.constant 0 : i32
    %c0_i32_0 = arith.constant 0 : i32
    %c0_i32_1 = arith.constant 0 : i32
    return %arg0, %c0_i32, %c0_i32_0 : i32, i32, i32
  }
  func.func @transform_3(%arg0: i32, %arg1: i32) -> (i32, i32, i32) {
    %c0_i32 = arith.constant 0 : i32
    %c0_i32_0 = arith.constant 0 : i32
    return %arg0, %c0_i32, %arg1 : i32, i32, i32
  }
}

</mosaic_0001>

<bundles_post_ra>
// kernel: categorical_conditional_batchnorm.2
= control target key start
LH: loop header
LB: loop body
LE: loop exit
PB: predicated region body
PF: predicated region fallthrough
CT: control target
= control target key end

     0   :  { %vm43_vm0 = vcmask 1043456   ;;  %vm54_vm1 = vcmask 3072   ;;  %vm75_vm2 = vcmask 11272   ;;  %s120_s0 = inlined_call_operand.vmem [shape: f32[2,4,256], index: 0, kind: input, shape index: {}]   ;;  %s121_s1 = inlined_call_operand.vmem [shape: f32[2,4,2], index: 1, kind: output, shape index: {}]  }
   0x1   :  { %v16_v0 = vld [vmem:[%s120_s0] sm:$0xff]  ;;  %v17_v1 = vld [vmem:[%s120_s0 + $0x8] sm:$0xff] }
   0x2   :  { %v39_v2 = vcombine.high %v16_v0, %v16_v0  ;;  %v44_v3 = vsel %vm43_vm0, %v16_v0, 0.0  ;;  %v26_v4 = vmul.f32 %v16_v0, %v16_v0  ;;  %v40_v5 = vcombine.high %v17_v1, %v17_v1 }
   0x3   :  { %v49_v6 = vsel %vm43_vm0, %v17_v1, 0.0  ;;  %v27_v7 = vmul.f32 %v17_v1, %v17_v1 }
   0x4   :  { %v45_v8 = vsel %vm43_vm0, %v39_v2, 0.0  ;;  %v61_v9 = vcombine.high %v26_v4, %v26_v4  ;;  %v65_v10 = vsel %vm43_vm0, %v26_v4, 0.0  ;;  %v50_v11 = vsel %vm43_vm0, %v40_v5, 0.0 }
   0x5   :  { %v46_v12 = vadd.f32 %v45_v8, %v44_v3  ;;  %v62_v13 = vcombine.high %v27_v7, %v27_v7  ;;  %v70_v15 = vsel %vm43_vm0, %v27_v7, 0.0  ;;  %v51_v17 = vadd.f32 %v50_v11, %v49_v6 }
   0x6   :  { %v66_v14 = vsel %vm43_vm0, %v61_v9, 0.0 }
   0x7   :  { %47 = vadd.xlane.f32.xlu0 %v46_v12  ;;  %v67_v16 = vadd.f32 %v66_v14, %v65_v10  ;;  %v71_v18 = vsel %vm43_vm0, %v62_v13, 0.0 }
   0x8   :  { %v72_v19 = vadd.f32 %v71_v18, %v70_v15 }
   0x9   :  { %68 = vadd.xlane.f32.xlu1 %v67_v16 }
   0xb   :  { %52 = vadd.xlane.f32.xlu0 %v51_v17 }
   0xd   :  { %73 = vadd.xlane.f32.xlu1 %v72_v19 }
  0x90   :  { %v48_v20 = vpop.xlane.xlu0 %47 }
  0x91   :  { %55 = vst.msk [vmem:[%s121_s1] sm:$0xf] %vm54_vm1, %v48_v20 }
  0x92   :  { %v69_v21 = vpop.xlane.xlu1 %68 }
  0x93   :  { %76 = vst.msk [vmem:[%s121_s1] sm:$0xf] %vm75_vm2, %v69_v21 }
  0x94   :  { %v53_v22 = vpop.xlane.xlu0 %52 }
  0x95   :  { %56 = vst.msk [vmem:[%s121_s1 + $0x4] sm:$0xf] %vm54_vm1, %v53_v22 }
  0x96   :  { %v74_v23 = vpop.xlane.xlu1 %73 }
  0x97   :  { %77 = vst.msk [vmem:[%s121_s1 + $0x4] sm:$0xf] %vm75_vm2, %v74_v23 }

// kernel: categorical_conditional_batchnorm.3
= control target key start
LH: loop header
LB: loop body
LE: loop exit
PB: predicated region body
PF: predicated region fallthrough
CT: control target
= control target key end

     0   :  { %v82_v0 = vmov 0   ;;  %v83_v5 = vmov 839922192   ;;  %v29_v7 = vlaneseq  ;;  %s128_s2 = inlined_call_operand.vmem [shape: f32[2,4,1], index: 2, kind: input, shape index: {}]   ;;  %s129_s1 = inlined_call_operand.vmem [shape: f32[2,4,1], index: 1, kind: input, shape index: {}]   ;;  %s130_s0 = inlined_call_operand.vmem [shape: f32[2,4,256], index: 0, kind: input, shape index: {}]   ;;  %s131_s3 = inlined_call_operand.vmem [shape: f32[2,4,256], index: 3, kind: output, shape index: {}]  }
   0x1   :  { %81 = vset.pattern.permute.xlu1 %v82_v0  ;;  %80 = vset.pattern.permute.xlu0 %v82_v0  ;;  %v44_v1 = vld [vmem:[%s128_s2] sm:$0xf]  ;;  %v45_v3 = vld [vmem:[%s128_s2 + $0x4] sm:$0xf]  ;;  %v27_v6 = vunpack.c.l.s4 %v83_v5  ;;  %v15_v19 = vld [vmem:[%s130_s0 + $0x8] sm:$0xff] }
   0x2   :  { %v16_v2 = vld [vmem:[%s129_s1] sm:$0xf]  ;;  %48 = vperm.xlu1 %81, %v44_v1   ;;  %v17_v4 = vld [vmem:[%s129_s1 + $0x4] sm:$0xf]  ;;  %v30_v9 = vshrl.u32 %v29_v7, 7 }
   0x3   :  { %20 = vperm.xlu0 %80, %v16_v2   ;;  %v28_v8 = vunpack.c.0.s8 %v27_v6  ;;  %v14_v13 = vld [vmem:[%s130_s0] sm:$0xff] }
   0x5   :  { %v31_v10 = vsub.s32 %v28_v8, %v30_v9 }
   0x6   :  { %52 = vperm.xlu1 %81, %v45_v3  }
   0x7   :  { %24 = vperm.xlu0 %80, %v17_v4  }
  0x7d   :  { %v49_v11 = vpop.permute.xlu1 %48 }
  0x7e   :  { %v21_v12 = vpop.permute.xlu0 %20  ;;  %v60_v14 = vrot.slane %v49_v11, %v31_v10 }
  0x7f   :  { %v32_v15 = vrot.slane %v21_v12, %v31_v10 }
  0x81   :  { %v42_v16 = vmul.f32 %v32_v15, %v14_v13  ;;  %v53_v17 = vpop.permute.xlu1 %52 }
  0x82   :  { %v25_v18 = vpop.permute.xlu0 %24  ;;  %v67_v22 = vrot.slane %v53_v17, %v31_v10 }
  0x83   :  { %v70_v20 = vadd.f32 %v60_v14, %v42_v16  ;;  %v39_v21 = vrot.slane %v25_v18, %v31_v10 }
  0x85   :  { %72 = vst [vmem:[%s131_s3] sm:$0xff] %v70_v20  ;;  %v43_v23 = vmul.f32 %v39_v21, %v15_v19 }
  0x87   :  { %v71_v24 = vadd.f32 %v67_v22, %v43_v23 }
  0x89   :  { %73 = vst [vmem:[%s131_s3 + $0x8] sm:$0xff] %v71_v24 }

</bundles_post_ra>
